<compile_context>
chip_gen: v5e
topology: v5e:2x2
jax: 0.10.0
libtpu: 0.0.40
codegen_flags: <defaults>
</compile_context>

<pallas_src>
import functools
import math

import jax
import jax.numpy as jnp
import numpy as np
from jax.experimental import pallas as pl
from jax.experimental.pallas import tpu as pltpu


def _round_up(a: int, b: int) -> int:
    return -(-a // b) * b


def _vmem_capacity_bytes() -> int:
    try:
        return int(pltpu.get_tpu_info().vmem_capacity_bytes)
    except Exception:
        return 64 * 1024 * 1024  # conservative fallback (safe on every generation)


def _soft_ce_spatial_kernel(x_ref, t_ref, out_ref, *, ignore_index, has_ignore,
                            suffix, nll_w, smooth_w):
    """One (batch-row, column-tile) block: class axis on sublanes, spatial on lanes.

    x_ref: (1, C, T) logits; t_ref: (1, 1, T) int8/int32 targets;
    out_ref: (1, 1, 1, 1) weighted partial sum for this block.
    """
    j = pl.program_id(1)

    x = x_ref[0].astype(jnp.float32)        # (C, T)
    t = t_ref[0].astype(jnp.int32)          # (1, T)
    num_classes, tile_cols = x.shape

    # Mask the ragged tail of the boundary column tile in-kernel (no wrapper
    # pad): Pallas leaves the out-of-bounds part of a boundary block undefined.
    lane_id = jax.lax.broadcasted_iota(jnp.int32, (1, tile_cols), 1)
    col_valid = lane_id < (suffix - j * tile_cols)

    valid = col_valid
    if has_ignore:
        valid = valid & (t != ignore_index)
    t_safe = jnp.where(valid, t, 0)

    # log_softmax pieces per column: log_prob = x - lse
    m = jnp.max(x, axis=0, keepdims=True)                                 # (1, T)
    lse = m + jnp.log(jnp.sum(jnp.exp(x - m), axis=0, keepdims=True))     # (1, T)

    # gather x[target[col], col] via one-hot compare over the class (sublane) axis
    # TODO(synk): out-of-range targets silently contribute `lse` instead of
    # raising like PyTorch.
    class_ids = jax.lax.broadcasted_iota(jnp.int32, x.shape, 0)           # (C, T)
    x_at_t = jnp.sum(jnp.where(class_ids == t_safe, x, 0.0),
                     axis=0, keepdims=True)                               # (1, T)

    # nll = lse - x[target];  smooth = C*lse - sum_c x[c]   (masked to 0)
    nll = jnp.where(valid, lse - x_at_t, 0.0)
    smooth = jnp.where(
        valid, num_classes * lse - jnp.sum(x, axis=0, keepdims=True), 0.0)

    # Weighted per-block partial (weights are compile-time constants).
    partial = nll_w * jnp.sum(nll) + smooth_w * jnp.sum(smooth)
    out_ref[...] = partial.reshape(1, 1, 1, 1)


def _soft_ce_lastdim_kernel(x_ref, t_ref, out_ref, *, ignore_index, has_ignore,
                            num_rows, nll_w, smooth_w):
    """One row-tile block: rows on sublanes, classes on lanes (class dim is last).

    x_ref: (TR, C) logits; t_ref: (TR, 1) int32 targets; out_ref: (1, 1, 1).
    """
    i = pl.program_id(0)

    x = x_ref[...].astype(jnp.float32)      # (TR, C)
    t = t_ref[...].astype(jnp.int32)        # (TR, 1)
    tile_rows, num_classes = x.shape

    row_id = jax.lax.broadcasted_iota(jnp.int32, (tile_rows, 1), 0)
    row_valid = row_id < (num_rows - i * tile_rows)

    valid = row_valid
    if has_ignore:
        valid = valid & (t != ignore_index)
    t_safe = jnp.where(valid, t, 0)

    m = jnp.max(x, axis=1, keepdims=True)                                 # (TR, 1)
    lse = m + jnp.log(jnp.sum(jnp.exp(x - m), axis=1, keepdims=True))     # (TR, 1)

    class_ids = jax.lax.broadcasted_iota(jnp.int32, x.shape, 1)           # (TR, C)
    x_at_t = jnp.sum(jnp.where(class_ids == t_safe, x, 0.0),
                     axis=1, keepdims=True)                               # (TR, 1)

    nll = jnp.where(valid, lse - x_at_t, 0.0)
    smooth = jnp.where(
        valid, num_classes * lse - jnp.sum(x, axis=1, keepdims=True), 0.0)

    partial = nll_w * jnp.sum(nll) + smooth_w * jnp.sum(smooth)
    out_ref[...] = partial.reshape(1, 1, 1)


def soft_cross_entropy_loss(x, target, *, smooth_factor: float = 0.0,
                            ignore_index=-100, reduction: str = "mean", dim: int = 1):
    """JAX/Pallas equivalent of SoftCrossEntropyLoss.forward(input, target)."""
    if reduction not in ("mean", "sum"):
        # TODO(synk): reduction='none' (per-element loss tensor) not implemented.
        raise NotImplementedError(f"reduction={reduction!r}")

    ndim = x.ndim
    dim = dim % ndim
    num_classes = x.shape[dim]
    prefix = int(math.prod(x.shape[:dim]))
    suffix = int(math.prod(x.shape[dim + 1:]))
    num_elements = prefix * suffix

    has_ignore = ignore_index is not None
    ii = int(ignore_index) if has_ignore else 0
    nll_w = float(1.0 - smooth_factor)
    smooth_w = float(smooth_factor) / float(num_classes)

    itemsize = x.dtype.itemsize
    vmem_cap = _vmem_capacity_bytes()
    usable = (vmem_cap * 3) // 4          # headroom for compiler-internal scratch
    # Per pipeline step pull ~2-4 MiB of real logits bytes from HBM (enough to
    # sit on the HBM roofline on every generation; larger on 128 MiB parts).
    per_step_logits_bytes = (4 * 1024 * 1024 if vmem_cap >= 96 * 1024 * 1024
                             else 2 * 1024 * 1024)

    if suffix == 1:
        # ---- channels-last path: class dim is the LAST axis (e.g. (B, T, V)) ----
        rows = prefix
        x2d = x.reshape(rows, num_classes)
        # Targets are a negligible fraction of HBM bytes here; keep them int32.
        t2d = target.reshape(rows, 1).astype(jnp.int32)

        lane_c = _round_up(num_classes, 128)
        row_bytes = (2 * (lane_c * itemsize + 128 * 4)    # double-buffered inputs
                     + 6 * lane_c * 4)                    # f32 in-kernel temporaries
        tile_rows = (per_step_logits_bytes // max(num_classes * itemsize, 1)) // 32 * 32
        usable_rows = (usable // row_bytes) // 32 * 32
        tile_rows = max(32, min(tile_rows, usable_rows))
        if tile_rows >= rows:
            tile_rows = rows              # single tile; extent == full dim is legal
        num_row_tiles = pl.cdiv(rows, tile_rows)
        vmem_limit = int(min(usable, max(32 * 1024 * 1024,
                                         tile_rows * row_bytes + 2 * 1024 * 1024)))

        kernel = functools.partial(_soft_ce_lastdim_kernel, ignore_index=ii,
                                   has_ignore=has_ignore, num_rows=rows,
                                   nll_w=nll_w, smooth_w=smooth_w)
        partials = pl.pallas_call(
            kernel,
            out_shape=jax.ShapeDtypeStruct((num_row_tiles, 1, 1), jnp.float32),
            grid_spec=pltpu.PrefetchScalarGridSpec(
                num_scalar_prefetch=0,
                grid=(num_row_tiles,),
                in_specs=[
                    pl.BlockSpec((tile_rows, num_classes), lambda i: (i, 0)),
                    pl.BlockSpec((tile_rows, 1), lambda i: (i, 0)),
                ],
                out_specs=pl.BlockSpec((1, 1, 1), lambda i: (i, 0, 0)),
            ),
            compiler_params=pltpu.CompilerParams(
                dimension_semantics=("parallel",),
                vmem_limit_bytes=vmem_limit,
            ),
        )(x2d, t2d)
    else:
        # ---- spatial path: class axis on sublanes, spatial axis on lanes ----
        x3d = x.reshape(prefix, num_classes, suffix)      # free reshape, no transpose
        # Narrow targets to int8 when classes + ignore_index fit: 4x fewer
        # target HBM bytes (they are ~20-33% of traffic for small class counts).
        if num_classes <= 127 and (-128 <= ii <= 127):
            tgt_dtype = jnp.int8
        else:
            tgt_dtype = jnp.int32
        t3d = target.reshape(prefix, 1, suffix).astype(tgt_dtype)

        sublane = max(8, 32 // itemsize)                  # sublane tile rows for x dtype
        logits_col_bytes = _round_up(num_classes, sublane) * itemsize
        tgt_col_bytes = 32                                # (1, T) block padded to a sublane stack
        col_bytes = (2 * (logits_col_bytes + tgt_col_bytes)   # double-buffered inputs
                     + 6 * _round_up(num_classes, 8) * 4)     # f32 in-kernel temporaries
        # TODO(synk): no class-axis tiling — a single (C, 128) column tile must fit VMEM.
        tile_cols = (per_step_logits_bytes // max(num_classes * itemsize, 1)) // 128 * 128
        usable_cols = (usable // col_bytes) // 128 * 128
        tile_cols = max(128, min(tile_cols, usable_cols))
        if tile_cols >= suffix:
            tile_cols = suffix            # single full-width tile; extent == full dim is legal
        num_col_tiles = pl.cdiv(suffix, tile_cols)
        vmem_limit = int(min(usable, max(32 * 1024 * 1024,
                                         tile_cols * col_bytes + 2 * 1024 * 1024)))

        kernel = functools.partial(_soft_ce_spatial_kernel, ignore_index=ii,
                                   has_ignore=has_ignore, suffix=suffix,
                                   nll_w=nll_w, smooth_w=smooth_w)
        partials = pl.pallas_call(
            kernel,
            out_shape=jax.ShapeDtypeStruct((prefix, num_col_tiles, 1, 1), jnp.float32),
            grid_spec=pltpu.PrefetchScalarGridSpec(
                num_scalar_prefetch=0,
                grid=(prefix, num_col_tiles),
                in_specs=[
                    pl.BlockSpec((1, num_classes, tile_cols), lambda n, j: (n, 0, j)),
                    pl.BlockSpec((1, 1, tile_cols), lambda n, j: (n, 0, j)),
                ],
                out_specs=pl.BlockSpec((1, 1, 1, 1), lambda n, j: (n, j, 0, 0)),
            ),
            compiler_params=pltpu.CompilerParams(
                # Every grid step writes its own partial -> both axes parallel,
                # so v7x's two TensorCores split the work even when prefix == 1.
                dimension_semantics=("parallel", "parallel"),
                vmem_limit_bytes=vmem_limit,
            ),
        )(x3d, t3d)

    total = jnp.sum(partials)
    if reduction == "mean":
        # Matches label_smoothed_nll_loss: masked_fill(0) then .mean() divides
        # by ALL elements, including ignore_index ones.
        return total / num_elements
    return total


def _reference(x, target, *, smooth_factor, ignore_index, dim, reduction="mean"):
    """Pure-JAX reference for validation."""
    dim = dim % x.ndim
    log_prob = jax.nn.log_softmax(x.astype(jnp.float32), axis=dim)
    lp = jnp.moveaxis(log_prob, dim, -1).reshape(-1, x.shape[dim])
    t = target.reshape(-1).astype(jnp.int32)
    valid = t != ignore_index
    t_safe = jnp.where(valid, t, 0)
    nll = -jnp.take_along_axis(lp, t_safe[:, None], axis=-1)[:, 0]
    smooth = -jnp.sum(lp, axis=-1)
    nll = jnp.where(valid, nll, 0.0)
    smooth = jnp.where(valid, smooth, 0.0)
    if reduction == "mean":
        nll_r, smooth_r = jnp.mean(nll), jnp.mean(smooth)
    else:
        nll_r, smooth_r = jnp.sum(nll), jnp.sum(smooth)
    eps_i = smooth_factor / x.shape[dim]
    return (1.0 - smooth_factor) * nll_r + eps_i * smooth_r


if __name__ == "__main__":
    key = jax.random.PRNGKey(0)
    k1, k2, k3, k4, k5, k6 = jax.random.split(key, 6)

    ignore_index = -100
    smooth_factor = 0.1

    # --- Case 1: NCHW segmentation-style logits, class dim = 1 (spatial path) ---
    N, C, H, W = 2, 4, 16, 16
    x = jax.random.normal(k1, (N, C, H, W), dtype=jnp.float32)
    target = jax.random.randint(k2, (N, H, W), 0, C, dtype=jnp.int32)
    ignore_mask = jax.random.bernoulli(k3, 0.1, (N, H, W))
    target = jnp.where(ignore_mask, ignore_index, target)

    loss = soft_cross_entropy_loss(
        x, target, smooth_factor=smooth_factor, ignore_index=ignore_index,
        reduction="mean", dim=1)
    loss = jax.block_until_ready(loss)
    ref = _reference(x, target, smooth_factor=smooth_factor,
                     ignore_index=ignore_index, dim=1)
    np.testing.assert_allclose(np.asarray(loss), np.asarray(ref),
                               rtol=1e-5, atol=1e-5)

    # --- Case 2: (B, T, V) token logits, class dim = last (channels-last path) ---
    B, T, V = 2, 8, 32
    x2 = jax.random.normal(k4, (B, T, V), dtype=jnp.float32)
    t2 = jax.random.randint(k5, (B, T), 0, V, dtype=jnp.int32)
    ignore_mask2 = jax.random.bernoulli(k6, 0.2, (B, T))
    t2 = jnp.where(ignore_mask2, ignore_index, t2)

    loss2 = soft_cross_entropy_loss(
        x2, t2, smooth_factor=smooth_factor, ignore_index=ignore_index,
        reduction="mean", dim=-1)
    loss2 = jax.block_until_ready(loss2)
    ref2 = _reference(x2, t2, smooth_factor=smooth_factor,
                      ignore_index=ignore_index, dim=-1)
    np.testing.assert_allclose(np.asarray(loss2), np.asarray(ref2),
                               rtol=1e-5, atol=1e-5)

    print("KERNEL_OK")
</pallas_src>

<mosaic_0001>
module attributes {stable_mosaic.version = 11 : i64} {
  func.func @_soft_ce_spatial_kernel(%arg0: i32, %arg1: i32, %arg2: memref<1x4x256xf32, #tpu.memory_space<vmem>>, %arg3: memref<1x1x256xi8, #tpu.memory_space<vmem>>, %arg4: memref<1x1x1x1xf32, #tpu.memory_space<vmem>>) attributes {dimension_semantics = [#tpu.dimension_semantics<parallel>, #tpu.dimension_semantics<parallel>], iteration_bounds = array<i64: 2, 1>, scalar_prefetch = 0 : i64, scratch_operands = 0 : i64, tpu.core_type = #tpu.core_type<tc>, window_params = [{transform_indices = @transform_0, window_bounds = array<i64: 1, 4, 256>}, {transform_indices = @transform_1, window_bounds = array<i64: 1, 1, 256>}, {transform_indices = @transform_2, window_bounds = array<i64: 1, 1, 1, 1>}]} {
    %c0 = arith.constant 0 : index
    %c0_0 = arith.constant 0 : index
    %c0_1 = arith.constant 0 : index
    %0 = vector.load %arg2[%c0, %c0_0, %c0_1] : memref<1x4x256xf32, #tpu.memory_space<vmem>>, vector<1x4x256xf32>
    %1 = vector.shape_cast %0 : vector<1x4x256xf32> to vector<4x256xf32>
    %c0_2 = arith.constant 0 : index
    %c0_3 = arith.constant 0 : index
    %c0_4 = arith.constant 0 : index
    %2 = vector.load %arg3[%c0_2, %c0_3, %c0_4] : memref<1x1x256xi8, #tpu.memory_space<vmem>>, vector<1x1x256xi8>
    %3 = vector.shape_cast %2 : vector<1x1x256xi8> to vector<1x256xi8>
    %4 = arith.extsi %3 : vector<1x256xi8> to vector<1x256xi32>
    %5 = tpu.iota {dimensions = array<i32: 1>} : vector<1x256xi32>
    %c256_i32 = arith.constant 256 : i32
    %6 = arith.muli %arg1, %c256_i32 : i32
    %c256_i32_5 = arith.constant 256 : i32
    %7 = arith.subi %c256_i32_5, %6 : i32
    %8 = vector.broadcast %7 : i32 to vector<1x256xi32>
    %9 = arith.cmpi slt, %5, %8 : vector<1x256xi32>
    %c-100_i32 = arith.constant -100 : i32
    %10 = vector.broadcast %c-100_i32 : i32 to vector<1x256xi32>
    %11 = arith.cmpi ne, %4, %10 : vector<1x256xi32>
    %12 = arith.andi %9, %11 : vector<1x256xi1>
    %c0_i32 = arith.constant 0 : i32
    %13 = vector.broadcast %c0_i32 : i32 to vector<1x256xi32>
    %14 = arith.select %12, %4, %13 : vector<1x256xi1>, vector<1x256xi32>
    %cst = arith.constant dense<0xFF800000> : vector<256xf32>
    %15 = vector.multi_reduction <maximumf>, %1, %cst [0] : vector<4x256xf32> to vector<256xf32>
    %16 = vector.shape_cast %15 : vector<256xf32> to vector<1x256xf32>
    %17 = vector.broadcast %16 : vector<1x256xf32> to vector<4x256xf32>
    %18 = arith.subf %1, %17 : vector<4x256xf32>
    %19 = math.exp %18 : vector<4x256xf32>
    %cst_6 = arith.constant dense<0.000000e+00> : vector<256xf32>
    %20 = vector.multi_reduction <add>, %19, %cst_6 [0] : vector<4x256xf32> to vector<256xf32>
    %21 = vector.shape_cast %20 : vector<256xf32> to vector<1x256xf32>
    %22 = math.log %21 : vector<1x256xf32>
    %23 = arith.addf %16, %22 : vector<1x256xf32>
    %24 = tpu.iota {dimensions = array<i32: 0>} : vector<4x256xi32>
    %25 = vector.broadcast %14 : vector<1x256xi32> to vector<4x256xi32>
    %26 = arith.cmpi eq, %24, %25 : vector<4x256xi32>
    %cst_7 = arith.constant 0.000000e+00 : f32
    %27 = vector.broadcast %cst_7 : f32 to vector<4x256xf32>
    %28 = arith.select %26, %1, %27 : vector<4x256xi1>, vector<4x256xf32>
    %cst_8 = arith.constant dense<0.000000e+00> : vector<256xf32>
    %29 = vector.multi_reduction <add>, %28, %cst_8 [0] : vector<4x256xf32> to vector<256xf32>
    %30 = vector.shape_cast %29 : vector<256xf32> to vector<1x256xf32>
    %31 = arith.subf %23, %30 : vector<1x256xf32>
    %cst_9 = arith.constant 0.000000e+00 : f32
    %32 = vector.broadcast %cst_9 : f32 to vector<1x256xf32>
    %33 = arith.select %12, %31, %32 : vector<1x256xi1>, vector<1x256xf32>
    %cst_10 = arith.constant 4.000000e+00 : f32
    %34 = vector.broadcast %cst_10 : f32 to vector<1x256xf32>
    %35 = arith.mulf %34, %23 : vector<1x256xf32>
    %cst_11 = arith.constant dense<0.000000e+00> : vector<256xf32>
    %36 = vector.multi_reduction <add>, %1, %cst_11 [0] : vector<4x256xf32> to vector<256xf32>
    %37 = vector.shape_cast %36 : vector<256xf32> to vector<1x256xf32>
    %38 = arith.subf %35, %37 : vector<1x256xf32>
    %cst_12 = arith.constant 0.000000e+00 : f32
    %39 = vector.broadcast %cst_12 : f32 to vector<1x256xf32>
    %40 = arith.select %12, %38, %39 : vector<1x256xi1>, vector<1x256xf32>
    %41 = vector.shape_cast %33 : vector<1x256xf32> to vector<1x1x256xf32>
    %cst_13 = arith.constant dense<0.000000e+00> : vector<1xf32>
    %42 = vector.multi_reduction <add>, %41, %cst_13 [1, 2] : vector<1x1x256xf32> to vector<1xf32>
    %43 = vector.shape_cast %42 : vector<1xf32> to vector<1x1x1xf32>
    %44 = vector.extract %43[0, 0, 0] : f32 from vector<1x1x1xf32>
    %cst_14 = arith.constant 0.899999976 : f32
    %45 = arith.mulf %cst_14, %44 : f32
    %46 = vector.shape_cast %40 : vector<1x256xf32> to vector<1x1x256xf32>
    %cst_15 = arith.constant dense<0.000000e+00> : vector<1xf32>
    %47 = vector.multi_reduction <add>, %46, %cst_15 [1, 2] : vector<1x1x256xf32> to vector<1xf32>
    %48 = vector.shape_cast %47 : vector<1xf32> to vector<1x1x1xf32>
    %49 = vector.extract %48[0, 0, 0] : f32 from vector<1x1x1xf32>
    %cst_16 = arith.constant 2.500000e-02 : f32
    %50 = arith.mulf %cst_16, %49 : f32
    %51 = arith.addf %45, %50 : f32
    %52 = vector.broadcast %51 : f32 to vector<1x1x1x1xf32>
    %c0_17 = arith.constant 0 : index
    %c0_18 = arith.constant 0 : index
    %c0_19 = arith.constant 0 : index
    %c0_20 = arith.constant 0 : index
    %53 = vector.load %arg4[%c0_17, %c0_18, %c0_19, %c0_20] : memref<1x1x1x1xf32, #tpu.memory_space<vmem>>, vector<1x1x1x1xf32>
    tpu.vector_store %arg4[%c0_17, %c0_18, %c0_19, %c0_20], %52 {strides = array<i32>} : memref<1x1x1x1xf32, #tpu.memory_space<vmem>>, vector<1x1x1x1xf32>,
    return
  }
  func.func @transform_0(%arg0: i32, %arg1: i32) -> (i32, i32, i32) {
    %c0_i32 = arith.constant 0 : i32
    %c0_i32_0 = arith.constant 0 : i32
    return %arg0, %c0_i32, %arg1 : i32, i32, i32
  }
  func.func @transform_1(%arg0: i32, %arg1: i32) -> (i32, i32, i32) {
    %c0_i32 = arith.constant 0 : i32
    %c0_i32_0 = arith.constant 0 : i32
    return %arg0, %c0_i32, %arg1 : i32, i32, i32
  }
  func.func @transform_2(%arg0: i32, %arg1: i32) -> (i32, i32, i32, i32) {
    %c0_i32 = arith.constant 0 : i32
    %c0_i32_0 = arith.constant 0 : i32
    %c0_i32_1 = arith.constant 0 : i32
    return %arg0, %arg1, %c0_i32, %c0_i32_0 : i32, i32, i32, i32
  }
}

</mosaic_0001>

<bundles_post_ra>
// kernel: tpu_custom_call.1
= control target key start
LH: loop header
LB: loop body
LE: loop exit
PB: predicated region body
PF: predicated region fallthrough
CT: control target
= control target key end

     0   :  { %7 = vsyncpa [#allocation3], 0  ;;  %s797_s0 = inlined_call_operand.hbm [shape: f32[2,4,256], index: 0, kind: input, shape index: {}]   ;;  %s798_s1 = inlined_call_operand.vmem [shape: s8[2,1,256], index: 1, kind: input, shape index: {}]   ;;  %s799_s2 = inlined_call_operand.vmem [shape: f32[2,1,1,1], index: 2, kind: output, shape index: {}]  }
   0x1   :  { %9 = vsyncpa [#allocation3 + $0x1], 0  ;;  %s655_s9 = smov 0   ;;  %s657_s10 = smov 0  }
   0x2   :  { %s659_s11 = smov 0   ;;  %s661_s12 = smov 0  }
   0x3   :  { %s663_s13 = smov 0   ;;  %s665_s14 = smov 0  }
   0x4 LB: > { %s478_s15 = sadd.s32 4294967295, %s637_s14   ;;  %s27_s16 = sadd.s32 1, %s633_s13  ;;  %s637_s14 = sphi %s665_s14, %s15_s14   ;;  %s633_s13 = sphi %s663_s13, %s810_s13   ;;  %s629_s12 = sphi %s661_s12, %s809_s12   ;;  %s625_s11 = sphi %s659_s11, %s808_s11   ;;  %s621_s10 = sphi %s657_s10, %s807_s10   ;;  %s617_s9 = sphi %s655_s9, %s806_s9  }
   0x5   : > { %p29_p0 = scmp.ge.s32.totalorder %s27_s16, 2  ;;  %s36_s17 = sadd.s32 1, %s625_s11 }
   0x6   : > { %p43_p1 = scmp.ne.s32.totalorder %s625_s11, %s621_s10  ;;  %p44_p2 = scmp.eq.s32.totalorder %s637_s14, 0 }
   0x7   : > { %s812_s16 = smov (%p29_p0, %s27_s16), 0  ;;  %p49_p4 = scmp.ne.s32.totalorder %s621_s10, %s617_s9 }
   0x8   : > { %p691_p3 = por %p44_p2, %p43_p1  ;;  %s31_s19 = ssub.s32 %s633_s13, %s812_s16 }
   0x9   : > { %p50_p5 = scmp.eq.s32.totalorder %s478_s15, 0  ;;  %p34_p6 = scmp.eq.s32.totalorder %s31_s19, 0 }
   0xa   : > { %p501_p8 = scmp.lt.s32.totalorder %s637_s14, 2  ;;  %s129_s22 = sand.u32 1, %s625_s11  }
   0xb   : > { %p698_p7 = por %p50_p5, %p49_p4  ;;  %s490_s23 = sshll.u32 %s633_s13, 3 }
   0xc   : > { %s704_s21 = scalar_select %p34_p6, %s625_s11, %s36_s17  }
   0xd   : > { %s482_s24 = sshll.u32 %s129_s22, 3  ;;  %s140_s27 = scalar_lea.hbm %s797_s0, %s490_s23 }
   0xe   : > { %s142_s28 = sshll.u32 %s140_s27, 4  ;;  %s133_s29 = scalar_lea.vmem [#allocation2], %s482_s24  ;;  %s143_s28 = int_to_ptr.hbm [resolvable:$true] %s142_s28 }
   0xf   : > { %s144_s30 = sshll.u32 %s133_s29, 4  ;;  %p498_p9 = pnand %p501_p8, %p691_p3  ;;  %s145_s30 = int_to_ptr.vmem [resolvable:$true] %s144_s30 }
  0x10   : > { %p485_p10 = scmp.ge.s32.totalorder %s637_s14, 1  ;;  %p161_p11 = scmp.lt.s32.totalorder %s637_s14, 3 }
  0x11   : > { %s130_s3 = scalar_lea.sflag [#allocation3], %s129_s22 }
  0x12   : > { %500 = dma.hbm_to_vmem [thread:$0]  (!%p498_p9), %s143_s28, 128, %s145_s30, %s130_s3  }
  0x13   : > { %p162_p12 = pnand %p485_p10, %p161_p11 }
  0x14   : > { %s167_s4 = sand.u32 (!%p162_p12), 1, %s621_s10  }
  0x15   : > { %165 = sbr.rel (%p162_p12) target bundleno = 294 (0x126), region = 28  ;;  %s486_s5 = sshll.u32 (!%p162_p12), %s167_s4, 3 }
  0x16   : > { %s168_s6 = scalar_lea.sflag (!%p162_p12), [#allocation3], %s167_s4  ;;  %s171_s7 = scalar_lea.vmem (!%p162_p12), [#allocation2], %s486_s5 }
  0x1a   : > { %612 = dma.done.wait (%p698_p7), %s168_s6, 128  }
  0x1b   : > { %614 = vsyncadd (%p698_p7), %s168_s6, 4294967168  ;;  %v720_v0 = vld [vmem:[%s171_s7] sm:$0xff]  ;;  %vm247_vm0 = vcmask 1043456   ;;  %p204_p13 = scmp.lt.s32.totalorder %s629_s12, 1  ;;  %v639_v23 = vmov 0   ;;  %v296_v32 = vlaneseq  ;;  %vm352_vm6 = vcmask 1040384  }
  0x1c   : > { %242 = vst [vmem:[#allocation1] ss:$2 sm:$0xff] %v720_v0  ;;  %vm381_vm7 = vcmask 0  }
  0x1d   : > { %s814_s12 = smov (!%p204_p13, %s629_s12), 1  ;;  %v297_v39 = vshrl.u32 %v296_v32, 7 }
  0x1e   : > { %s487_s8 = sshll.u32 %s814_s12, 1  ;;  %s217_s25 = scalar_lea.vmem %s799_s2, %s814_s12 }
  0x1f   : > { %s210_s17 = scalar_lea.vmem %s798_s1, %s487_s8 }
  0x20   : > { %v219_v17 = vld [vmem:[%s210_s17] sm:$0x3] }
  0x21   : > { %v220_v20 = vunpack.c.0.s8 %v219_v17 }
  0x23   : > { %v243_v1 = vld.sshfl [vmem:[#allocation1] sm:$0xff pattern:$0x75316420]  ;;  %v244_v2 = vld.sshfl [vmem:[#allocation1 + $0x8] sm:$0xff pattern:$0x75316420] }
  0x24   : > { %v248_v3 = vsel %vm247_vm0, %v243_v1, -inf  ;;  %v255_v5 = vsel %vm247_vm0, %v244_v2, -inf  ;;  %vm229_vm1 = vcmp.ne.s32.totalorder %v220_v20, 4294967196  ;;  %v237_v28 = vperm.slane %v220_v20, 0 }
  0x25   : > { %v249_v4 = vrot.slane %v248_v3, 4  ;;  %v256_v6 = vrot.slane %v255_v5, 4  ;;  %v230_v24 = vsel %vm229_vm1, 1, %v639_v23  ;;  %v238_v29 = vperm.slane %v220_v20, 4 }
  0x26   : > { %v231_v26 = vperm.slane %v230_v24, 0  ;;  %v232_v27 = vperm.slane %v230_v24, 4 }
  0x27   : > { %v250_v7 = vmax.f32 %v248_v3, %v249_v4  ;;  %v257_v8 = vmax.f32 %v255_v5, %v256_v6 }
  0x28   : > { %vm741_vm2 = vcmp.ne.s32.totalorder %v231_v26, 0  ;;  %vm745_vm3 = vcmp.ne.s32.totalorder %v232_v27, 0 }
  0x29   : > { %v251_v9 = vrot.slane %v250_v7, 2  ;;  %v258_v10 = vrot.slane %v257_v8, 2  ;;  %v239_v33 = vsel %vm741_vm2, %v237_v28, 0  ;;  %v240_v34 = vsel %vm745_vm3, %v238_v29, 0 }
  0x2a   : > { %v298_v42 = vperm.slane %v239_v33, 0  ;;  %v299_v43 = vperm.slane %v240_v34, 0 }
  0x2b   : > { %v252_v11 = vmax.f32 %v250_v7, %v251_v9  ;;  %v259_v12 = vmax.f32 %v257_v8, %v258_v10 }
  0x2c   : > { %vm300_vm4 = vcmp.eq.s32.totalorder %v297_v39, %v298_v42  ;;  %vm301_vm5 = vcmp.eq.s32.totalorder %v297_v39, %v299_v43 }
  0x2d   : > { %v253_v13 = vrot.slane %v252_v11, 1  ;;  %v260_v14 = vrot.slane %v259_v12, 1 }
  0x2f   : > { %v733_v15 = vmax.f32 %v252_v11, %v253_v13  ;;  %v735_v16 = vmax.f32 %v259_v12, %v260_v14 }
  0x31   : > { %v264_v18 = vrot.slane %v735_v16, 4 }
  0x33   : > { %v265_v19 = vsel %vm247_vm0, %v733_v15, %v264_v18 }
  0x34   : > { %v267_v21 = vsub.f32 %v720_v0, %v265_v19 }
  0x36   : > { %v268_v22 = vmul.f32 1.442695, %v267_v21 }
  0x38   : > { %551 = vpow2.f32 %v268_v22 }
  0x3e   : > { %v552_v25 = vpop.eup %551 }
  0x3f   : > { %271 = vst [vmem:[#allocation1] ss:$2 sm:$0xff] %v552_v25 }
  0x46   : > { %v272_v35 = vld.sshfl [vmem:[#allocation1] sm:$0xff pattern:$0x75316420]  ;;  %v273_v36 = vld.sshfl [vmem:[#allocation1 + $0x8] sm:$0xff pattern:$0x75316420] }
  0x47   : > { %v276_v37 = vsel %vm247_vm0, %v272_v35, 0.0  ;;  %v283_v38 = vsel %vm247_vm0, %v273_v36, 0.0  ;;  %302 = vst [vmem:[#allocation1] ss:$2 sm:$0xff] %v720_v0 }
  0x48   : > { %v277_v40 = vrot.slane %v276_v37, 4  ;;  %v284_v41 = vrot.slane %v283_v38, 4 }
  0x4a   : > { %v278_v44 = vadd.f32 %v277_v40, %v276_v37  ;;  %v285_v45 = vadd.f32 %v284_v41, %v283_v38 }
  0x4c   : > { %v279_v46 = vrot.slane %v278_v44, 2  ;;  %v286_v47 = vrot.slane %v285_v45, 2 }
  0x4e   : > { %v280_v48 = vadd.f32 %v279_v46, %v278_v44  ;;  %v287_v49 = vadd.f32 %v286_v47, %v285_v45  ;;  %v303_v50 = vld.sshfl [vmem:[#allocation1] sm:$0xff pattern:$0x75316420]  ;;  %v304_v51 = vld.sshfl [vmem:[#allocation1 + $0x8] sm:$0xff pattern:$0x75316420] }
  0x4f   : > { %v307_v52 = vsel %vm300_vm4, %v303_v50, 0.0  ;;  %v308_v53 = vsel %vm301_vm5, %v304_v51, 0.0  ;;  %329 = vst [vmem:[#allocation1] ss:$2 sm:$0xff] %v720_v0 }
  0x50   : > { %v281_v54 = vrot.slane %v280_v48, 1  ;;  %v288_v55 = vrot.slane %v287_v49, 1  ;;  %v309_v56 = vsel %vm247_vm0, %v307_v52, 0.0  ;;  %v316_v57 = vsel %vm247_vm0, %v308_v53, 0.0 }
  0x51   : > { %v310_v58 = vrot.slane %v309_v56, 4  ;;  %v317_v59 = vrot.slane %v316_v57, 4 }
  0x52   : > { %v282_v60 = vadd.f32 %v281_v54, %v280_v48  ;;  %v289_v61 = vadd.f32 %v288_v55, %v287_v49 }
  0x53   : > { %v311_v62 = vadd.f32 %v310_v58, %v309_v56  ;;  %v318_v63 = vadd.f32 %v317_v59, %v316_v57 }
  0x54   : > { %553 = vlog2.f32 %v282_v60 }
  0x55   : > { %555 = vlog2.f32 %v289_v61  ;;  %v312_v1 = vrot.slane %v311_v62, 2  ;;  %v319_v2 = vrot.slane %v318_v63, 2 }
  0x56   : > { %v330_v3 = vld.sshfl [vmem:[#allocation1] sm:$0xff pattern:$0x75316420]  ;;  %v331_v4 = vld.sshfl [vmem:[#allocation1 + $0x8] sm:$0xff pattern:$0x75316420] }
  0x57   : > { %v313_v5 = vadd.f32 %v312_v1, %v311_v62  ;;  %v320_v0 = vadd.f32 %v319_v2, %v318_v63  ;;  %v334_v6 = vsel %vm247_vm0, %v330_v3, 0.0  ;;  %v341_v7 = vsel %vm247_vm0, %v331_v4, 0.0 }
  0x58   : > { %v335_v8 = vrot.slane %v334_v6, 4  ;;  %v342_v9 = vrot.slane %v341_v7, 4 }
  0x59   : > { %v314_v10 = vrot.slane %v313_v5, 1  ;;  %v321_v11 = vrot.slane %v320_v0, 1 }
  0x5a   : > { %v554_v12 = vpop.eup %553  ;;  %v336_v13 = vadd.f32 %v335_v8, %v334_v6  ;;  %v343_v14 = vadd.f32 %v342_v9, %v341_v7 }
  0x5b   : > { %v556_v17 = vpop.eup %555  ;;  %v291_v18 = vmul.f32 0.6931472, %v554_v12  ;;  %v315_v19 = vadd.f32 %v314_v10, %v313_v5  ;;  %v322_v21 = vadd.f32 %v321_v11, %v320_v0 }
  0x5c   : > { %v293_v20 = vmul.f32 0.6931472, %v556_v17  ;;  %v337_v22 = vrot.slane %v336_v13, 2  ;;  %v344_v23 = vrot.slane %v343_v14, 2 }
  0x5d   : > { %v294_v24 = vadd.f32 %v291_v18, %v733_v15 }
  0x5e   : > { %v295_v25 = vadd.f32 %v293_v20, %v735_v16  ;;  %v338_v26 = vadd.f32 %v337_v22, %v336_v13  ;;  %v345_v27 = vadd.f32 %v344_v23, %v343_v14 }
  0x5f   : > { %v323_v28 = vsub.f32 %v294_v24, %v315_v19  ;;  %v327_v29 = vmul.f32 4.0, %v294_v24 }
  0x60   : > { %v324_v32 = vsub.f32 %v295_v25, %v322_v21  ;;  %v328_v33 = vmul.f32 4.0, %v295_v25  ;;  %v339_v34 = vrot.slane %v338_v26, 1  ;;  %v346_v35 = vrot.slane %v345_v27, 1 }
  0x61   : > { %v325_v36 = vsel %vm741_vm2, %v323_v28, 0.0 }
  0x62   : > { %v326_v37 = vsel %vm745_vm3, %v324_v32, 0.0  ;;  %v353_v38 = vsel %vm352_vm6, %v325_v36, 0.0  ;;  %v340_v15 = vadd.f32 %v339_v34, %v338_v26  ;;  %v347_v39 = vadd.f32 %v346_v35, %v345_v27 }
  0x63   : > { %v354_v16 = vsel %vm352_vm6, %v326_v37, 0.0 }
  0x64   : > { %v355_v40 = vadd.f32 %v354_v16, %v353_v38  ;;  %v348_v41 = vsub.f32 %v327_v29, %v340_v15  ;;  %v349_v42 = vsub.f32 %v328_v33, %v347_v39 }
  0x66   : > { %356 = vadd.xlane.f32.xlu0 %v355_v40  ;;  %v350_v43 = vsel %vm741_vm2, %v348_v41, 0.0  ;;  %v351_v44 = vsel %vm745_vm3, %v349_v42, 0.0 }
  0x67   : > { %v366_v45 = vsel %vm352_vm6, %v350_v43, 0.0  ;;  %v367_v46 = vsel %vm352_vm6, %v351_v44, 0.0 }
  0x68   : > { %v368_v47 = vadd.f32 %v367_v46, %v366_v45 }
  0x6e   : > { %369 = vadd.xlane.f32.xlu0 %v368_v47 }
  0xd9   : > { %v357_v48 = vpop.xlane.xlu0 %356 }
  0xda   : > { %v358_v49 = vrot.slane %v357_v48, 4 }
  0xdc   : > { %v359_v50 = vadd.f32 %v358_v49, %v357_v48 }
  0xde   : > { %v360_v51 = vrot.slane %v359_v50, 2 }
  0xe0   : > { %v361_v52 = vadd.f32 %v360_v51, %v359_v50 }
  0xe1   : > { %v370_v53 = vpop.xlane.xlu0 %369 }
  0xe2   : > { %v371_v54 = vrot.slane %v370_v53, 4  ;;  %v362_v55 = vrot.slane %v361_v52, 1 }
  0xe4   : > { %v372_v30 = vadd.f32 %v371_v54, %v370_v53  ;;  %v363_v56 = vadd.f32 %v362_v55, %v361_v52 }
  0xe6   : > { %v373_v57 = vrot.slane %v372_v30, 2  ;;  %491 = vpush %v363_v56 }
  0xe8   : > { %v374_v31 = vadd.f32 %v373_v57, %v372_v30 }
  0xea   : > { %v375_v58 = vrot.slane %v374_v31, 1 }
  0xec   : > { %v376_v59 = vadd.f32 %v375_v58, %v374_v31 }
  0xee   : > { %493 = vpush %v376_v59 }
 0x117   : > { %s492_s18 = spop %491 }
 0x118   : > { %s365_s19 = smul.f32 0.9, %s492_s18 }
 0x11f   : > { %s494_s20 = spop %493 }
 0x120   : > { %s378_s22 = smul.f32 0.025, %s494_s20 }
 0x122   : > { %s379_s26 = sadd.f32 %s378_s22, %s365_s19 }
 0x124   : > { %v380_v60 = vstv %s379_s26 }
 0x125   : > { %382 = vst.msk [vmem:[%s217_s25] sm:$0x1] %vm381_vm7, %v380_v60 }
 0x126 PF: > { %s15_s14 = sadd.s32 1, %s637_s14   ;;  %s806_s9 = smov %s621_s10 }
 0x127   : > { %p12_p0 = scmp.ge.s32.totalorder %s15_s14, 4   ;;  %s807_s10 = smov %s625_s11 }
 0x128   : > { %s808_s11 = smov %s704_s21  ;;  %s809_s12 = smov %s633_s13 }
 0x129   : > { %s810_s13 = smov %s812_s16  ;;  %14 = sbr.rel (!%p12_p0) target bundleno = 4 (0x4), region = 71 }
 0x12e   :  { %406 = vsyncpa [#allocation3], 1 }
 0x12f   :  { %408 = vsyncpa [#allocation3 + $0x1], 1 }

</bundles_post_ra>
